<compile_context>
chip_gen: v5e
topology: v5e:2x2
jax: 0.10.0
libtpu: 0.0.40
codegen_flags: <defaults>
</compile_context>

<pallas_src>
import functools

import jax
import jax.numpy as jnp
from jax.experimental import pallas as pl
from jax.experimental.pallas import tpu as pltpu


def _label_smoothing_kernel(pred_ref, tgt_ref, out_ref, *, confidence, off_value,
                            classes, batch, block_rows):
    pid = pl.program_id(0)

    # Transpose in the native dtype (XLU slot has slack), then upcast: batch rides
    # the 128-lane axis and, for sub-32-bit inputs, the XLU moves fewer bytes.
    # TODO(synk): verify via bundle dump that this stays on the XLU (vxpose); if it
    # round-trips through VMEM, switch to pltpu.einshape("bc->cb", ...).
    pred_t = jnp.transpose(pred_ref[...]).astype(jnp.float32)          # (C, TB)

    tgt = tgt_ref[...]                                                  # (1, TB) int32

    # log-softmax pieces along the class (sublane) axis.
    col_max = jnp.max(pred_t, axis=0, keepdims=True)                    # (1, TB)
    shifted = pred_t - col_max                                          # (C, TB)
    lse = jnp.log(jnp.sum(jnp.exp(shifted), axis=0, keepdims=True))     # (1, TB)

    # sum_c log p = sum_c shifted - C * lse
    sum_logp = jnp.sum(shifted, axis=0, keepdims=True) - classes * lse  # (1, TB)

    # log p at the target class via masked extraction (no full true_dist tensor).
    class_ids = jax.lax.broadcasted_iota(jnp.int32, pred_t.shape, 0)    # (C, TB)
    shifted_tgt = jnp.sum(jnp.where(class_ids == tgt, shifted, 0.0),
                          axis=0, keepdims=True)                        # (1, TB)
    logp_tgt = shifted_tgt - lse                                        # (1, TB)

    # per-row loss = -( off*sum_logp + (confidence-off)*logp_tgt )
    per_row = -(off_value * sum_logp + (confidence - off_value) * logp_tgt)

    # Select-style mask of boundary-tile padding rows (blocks NaN/Inf from
    # unspecified padding).  Keep this as jnp.where on per_row.
    row_idx = pid * block_rows + jax.lax.broadcasted_iota(jnp.int32, per_row.shape, 1)
    per_row = jnp.where(row_idx < batch, per_row, 0.0)

    # Per-tile partial sum; mean over B is finished in the wrapper.
    out_ref[0, 0] = jnp.sum(per_row)


def _tpu_vmem_capacity_bytes():
    try:
        return int(pltpu.get_tpu_info().vmem_capacity_bytes)
    except Exception:
        return 64 * 1024 * 1024      # conservative (v7x-sized) fallback


def _pick_block_rows(batch, vmem_capacity):
    """Pick the batch tile against the lane-padded VMEM footprint.

    Padded per-row footprint (f32 worst case):
      pred double buffer : 2 * 128 lanes * 4 B       = 1024 B/row
      f32 working copies : ~6 * 32 sublanes * 4 B    =  768 B/row
    -> tb=16384 ~ 28 MiB (fits v5e/v6e's 128 MiB VMEM with a raised limit);
       cap at 8192 (~14 MiB) on v7x's 64 MiB VMEM.
    """
    tb_cap = 16384 if vmem_capacity >= 100 * 1024 * 1024 else 8192
    if batch <= 1024:
        return batch                 # single small tile; any alignment allowed
    # >=2 grid steps so the "parallel" axis can shard across v7x's two TCs;
    # tile is a multiple of 1024 (satisfies the (8,128) block constraints).
    target_tiles = max(2, -(-batch // tb_cap))
    tb = -(-batch // target_tiles)
    tb = ((tb + 1023) // 1024) * 1024
    return min(tb, tb_cap)


def label_smoothing_loss(pred, target, *, classes=30, smoothing=0.2):
    """Pallas equivalent of LabelSmoothingLoss(classes, smoothing)(pred, target).

    pred may be f32 or bf16 (bf16 halves HBM traffic; upcast happens in-kernel).
    """
    B, C = pred.shape
    assert C == classes, "pred's class dim must equal `classes`"

    confidence = float(1.0 - smoothing)
    off_value = float(smoothing) / float(classes - 1)

    vmem_capacity = _tpu_vmem_capacity_bytes()
    tb = _pick_block_rows(B, vmem_capacity)
    num_tiles = pl.cdiv(B, tb)

    tgt2d = target.astype(jnp.int32).reshape(1, B)      # lane-major targets

    kernel = functools.partial(
        _label_smoothing_kernel,
        confidence=confidence, off_value=off_value,
        classes=classes, batch=B, block_rows=tb,
    )

    partials = pl.pallas_call(
        kernel,
        out_shape=jax.ShapeDtypeStruct((1, num_tiles), jnp.float32),
        grid=(num_tiles,),
        in_specs=[
            pl.BlockSpec((tb, C), lambda i: (i, 0)),    # pred tile (native dtype)
            pl.BlockSpec((1, tb), lambda i: (0, i)),    # target tile (lane-major)
        ],
        out_specs=pl.BlockSpec((1, 1), lambda i: (0, i),
                               memory_space=pltpu.MemorySpace.SMEM),
        compiler_params=pltpu.CompilerParams(
            dimension_semantics=("parallel",),
            vmem_limit_bytes=int(vmem_capacity * 3 // 4)),
    )(pred, tgt2d)

    return jnp.sum(partials) / B


def _reference(pred, target, *, classes=30, smoothing=0.2):
    confidence = 1.0 - smoothing
    logp = jax.nn.log_softmax(pred.astype(jnp.float32), axis=-1)
    true_dist = jnp.full_like(logp, smoothing / (classes - 1))
    true_dist = true_dist.at[jnp.arange(pred.shape[0]), target].set(confidence)
    return jnp.mean(jnp.sum(-true_dist * logp, axis=-1))


if __name__ == "__main__":
    C = 30
    key = jax.random.PRNGKey(0)
    k1, k2, k3, k4 = jax.random.split(key, 4)

    # Small shape consistent with the module's forward: pred (B, classes), target (B,).
    pred_s = jax.random.normal(k1, (8, C), dtype=jnp.float32)
    tgt_s = jax.random.randint(k2, (8,), 0, C, dtype=jnp.int32)
    loss_s = jax.block_until_ready(
        label_smoothing_loss(pred_s, tgt_s, classes=C, smoothing=0.2))
    ref_s = _reference(pred_s, tgt_s, classes=C, smoothing=0.2)
    assert jnp.allclose(loss_s, ref_s, atol=1e-5, rtol=1e-5), (loss_s, ref_s)

    # Multi-tile path (exercises boundary masking + the parallel grid axis).
    Bm = 2500
    pred_m = jax.random.normal(k3, (Bm, C), dtype=jnp.float32)
    tgt_m = jax.random.randint(k4, (Bm,), 0, C, dtype=jnp.int32)
    loss_m = jax.block_until_ready(
        label_smoothing_loss(pred_m, tgt_m, classes=C, smoothing=0.2))
    ref_m = _reference(pred_m, tgt_m, classes=C, smoothing=0.2)
    assert jnp.allclose(loss_m, ref_m, atol=1e-4, rtol=1e-4), (loss_m, ref_m)

    print("KERNEL_OK")
</pallas_src>

<mosaic_0001>
module attributes {stable_mosaic.version = 11 : i64} {
  func.func @_label_smoothing_kernel(%arg0: i32, %arg1: memref<8x30xf32, #tpu.memory_space<vmem>>, %arg2: memref<1x8xi32, #tpu.memory_space<vmem>>, %arg3: memref<1x1xf32, #tpu.memory_space<smem>>) attributes {dimension_semantics = [#tpu.dimension_semantics<parallel>], iteration_bounds = array<i64: 1>, scalar_prefetch = 0 : i64, scratch_operands = 0 : i64, tpu.core_type = #tpu.core_type<tc>, window_params = [{transform_indices = @transform_0, window_bounds = array<i64: 8, 30>}, {transform_indices = @transform_1, window_bounds = array<i64: 1, 8>}, {transform_indices = @transform_2, window_bounds = array<i64: 1, 1>}]} {
    %c0 = arith.constant 0 : index
    %c0_0 = arith.constant 0 : index
    %0 = vector.load %arg1[%c0, %c0_0] : memref<8x30xf32, #tpu.memory_space<vmem>>, vector<8x30xf32>
    %1 = tpu.transpose %0, [1, 0] : vector<8x30xf32> -> vector<30x8xf32>
    %c0_1 = arith.constant 0 : index
    %c0_2 = arith.constant 0 : index
    %2 = vector.load %arg2[%c0_1, %c0_2] : memref<1x8xi32, #tpu.memory_space<vmem>>, vector<1x8xi32>
    %cst = arith.constant dense<0xFF800000> : vector<8xf32>
    %3 = vector.multi_reduction <maximumf>, %1, %cst [0] : vector<30x8xf32> to vector<8xf32>
    %4 = vector.shape_cast %3 : vector<8xf32> to vector<1x8xf32>
    %5 = vector.broadcast %4 : vector<1x8xf32> to vector<30x8xf32>
    %6 = arith.subf %1, %5 : vector<30x8xf32>
    %7 = math.exp %6 : vector<30x8xf32>
    %cst_3 = arith.constant dense<0.000000e+00> : vector<8xf32>
    %8 = vector.multi_reduction <add>, %7, %cst_3 [0] : vector<30x8xf32> to vector<8xf32>
    %9 = vector.shape_cast %8 : vector<8xf32> to vector<1x8xf32>
    %10 = math.log %9 : vector<1x8xf32>
    %cst_4 = arith.constant dense<0.000000e+00> : vector<8xf32>
    %11 = vector.multi_reduction <add>, %6, %cst_4 [0] : vector<30x8xf32> to vector<8xf32>
    %12 = vector.shape_cast %11 : vector<8xf32> to vector<1x8xf32>
    %cst_5 = arith.constant 3.000000e+01 : f32
    %13 = vector.broadcast %cst_5 : f32 to vector<1x8xf32>
    %14 = arith.mulf %13, %10 : vector<1x8xf32>
    %15 = arith.subf %12, %14 : vector<1x8xf32>
    %16 = tpu.iota {dimensions = array<i32: 0>} : vector<30x8xi32>
    %17 = vector.broadcast %2 : vector<1x8xi32> to vector<30x8xi32>
    %18 = arith.cmpi eq, %16, %17 : vector<30x8xi32>
    %cst_6 = arith.constant 0.000000e+00 : f32
    %19 = vector.broadcast %cst_6 : f32 to vector<30x8xf32>
    %20 = arith.select %18, %6, %19 : vector<30x8xi1>, vector<30x8xf32>
    %cst_7 = arith.constant dense<0.000000e+00> : vector<8xf32>
    %21 = vector.multi_reduction <add>, %20, %cst_7 [0] : vector<30x8xf32> to vector<8xf32>
    %22 = vector.shape_cast %21 : vector<8xf32> to vector<1x8xf32>
    %23 = arith.subf %22, %10 : vector<1x8xf32>
    %cst_8 = arith.constant 0.0068965517 : f32
    %24 = vector.broadcast %cst_8 : f32 to vector<1x8xf32>
    %25 = arith.mulf %24, %15 : vector<1x8xf32>
    %cst_9 = arith.constant 0.793103456 : f32
    %26 = vector.broadcast %cst_9 : f32 to vector<1x8xf32>
    %27 = arith.mulf %26, %23 : vector<1x8xf32>
    %28 = arith.addf %25, %27 : vector<1x8xf32>
    %cst_10 = arith.constant 0.000000e+00 : f32
    %29 = vector.broadcast %cst_10 : f32 to vector<1x8xf32>
    %30 = arith.subf %29, %28 : vector<1x8xf32>
    %c8_i32 = arith.constant 8 : i32
    %31 = arith.muli %arg0, %c8_i32 : i32
    %32 = tpu.iota {dimensions = array<i32: 1>} : vector<1x8xi32>
    %33 = vector.broadcast %31 : i32 to vector<1x8xi32>
    %34 = arith.addi %33, %32 : vector<1x8xi32>
    %c8_i32_11 = arith.constant 8 : i32
    %35 = vector.broadcast %c8_i32_11 : i32 to vector<1x8xi32>
    %36 = arith.cmpi slt, %34, %35 : vector<1x8xi32>
    %cst_12 = arith.constant 0.000000e+00 : f32
    %37 = vector.broadcast %cst_12 : f32 to vector<1x8xf32>
    %38 = arith.select %36, %30, %37 : vector<1x8xi1>, vector<1x8xf32>
    %39 = vector.shape_cast %38 : vector<1x8xf32> to vector<1x1x8xf32>
    %cst_13 = arith.constant dense<0.000000e+00> : vector<1xf32>
    %40 = vector.multi_reduction <add>, %39, %cst_13 [1, 2] : vector<1x1x8xf32> to vector<1xf32>
    %41 = vector.shape_cast %40 : vector<1xf32> to vector<1x1x1xf32>
    %42 = vector.extract %41[0, 0, 0] : f32 from vector<1x1x1xf32>
    %c0_14 = arith.constant 0 : index
    %c0_15 = arith.constant 0 : index
    %43 = memref.load %arg3[%c0_14, %c0_15] : memref<1x1xf32, #tpu.memory_space<smem>>
    memref.store %42, %arg3[%c0_14, %c0_15] : memref<1x1xf32, #tpu.memory_space<smem>>
    return
  }
  func.func @transform_0(%arg0: i32) -> (i32, i32) {
    %c0_i32 = arith.constant 0 : i32
    %c0_i32_0 = arith.constant 0 : i32
    return %arg0, %c0_i32 : i32, i32
  }
  func.func @transform_1(%arg0: i32) -> (i32, i32) {
    %c0_i32 = arith.constant 0 : i32
    %c0_i32_0 = arith.constant 0 : i32
    return %c0_i32, %arg0 : i32, i32
  }
  func.func @transform_2(%arg0: i32) -> (i32, i32) {
    %c0_i32 = arith.constant 0 : i32
    %c0_i32_0 = arith.constant 0 : i32
    return %c0_i32, %arg0 : i32, i32
  }
}

</mosaic_0001>

<bundles_post_ra>
// kernel: tpu_custom_call.1
= control target key start
LH: loop header
LB: loop body
LE: loop exit
PB: predicated region body
PF: predicated region fallthrough
CT: control target
= control target key end

     0   :  { %7 = vsyncpa [#allocation3], 0  ;;  %s328_s0 = inlined_call_operand.hbm [shape: f32[8,30], index: 0, kind: input, shape index: {}]   ;;  %s329_s1 = inlined_call_operand.hbm [shape: s32[1,8], index: 1, kind: input, shape index: {}]   ;;  %s330_s2 = inlined_call_operand.hbm [shape: f32[1,1], index: 2, kind: output, shape index: {}]  }
   0x1   :  { %8 = vsyncpa [#allocation6], 0 }
   0x2   :  { %9 = vsyncpa [#allocation4], 0  ;;  %s15_s11 = sshll.u32 %s328_s0, 4  ;;  %s283_s12 = smov [#allocation2]   ;;  %s16_s11 = int_to_ptr.hbm [resolvable:$true] %s15_s11 }
   0x3   :  { %s17_s13 = sshll.u32 %s283_s12, 4  ;;  %s26_s16 = sshll.u32 %s329_s1, 4  ;;  %s18_s13 = int_to_ptr.vmem [resolvable:$true] %s17_s13  ;;  %s27_s16 = int_to_ptr.hbm [resolvable:$true] %s26_s16 }
   0x4   :  { %20 = dma.hbm_to_vmem [thread:$0]  %s16_s11, 128, %s18_s13, [#allocation3]  }
   0x5   :  { %s284_s17 = smov [#allocation5]  }
   0x6   :  { %s28_s18 = sshll.u32 %s284_s17, 4  ;;  %s29_s18 = int_to_ptr.vmem [resolvable:$true] %s28_s18 }
   0x7   :  { %31 = dma.hbm_to_vmem [thread:$0]  %s27_s16, 16, %s29_s18, [#allocation6]  }
   0x8   :  { %277 = dma.done.wait [#allocation3], 128  }
   0x9   :  { %278 = vsyncadd [#allocation3], 4294967168 }
   0xa   :  { %279 = dma.done.wait [#allocation6], 16  }
   0xb   :  { %280 = vsyncadd [#allocation6], 4294967280  ;;  %v40_v0 = vld [vmem:[#allocation2] sm:$0xff]  ;;  %vm74_vm0 = vcmask 64512   ;;  %vm78_vm1 = vcmask 62464   ;;  %v131_v14 = vlaneseq  ;;  %vm170_vm7 = vcmask 57344  }
   0xc   :  { %41 = vxpose.xlu0.b32.start.end [1/1] (short) (narrow) %v40_v0, 32  ;;  %v206_v19 = vld [vmem:[#allocation5] ss:$0 sm:$0xff]  ;;  %s188_s19 = sshll.u32 %s330_s2, 4  ;;  %s285_s21 = smov [#allocation7]   ;;  %s189_s19 = int_to_ptr.hbm [resolvable:$true] %s188_s19 }
   0xd   :  { %v132_v17 = vshrl.u32 %v131_v14, 7 }
   0xf   :  { %v133_v21 = vadd.s32 8, %v132_v17  ;;  %v134_v22 = vadd.s32 16, %v132_v17  ;;  %vm137_vm2 = vcmp.eq.s32.totalorder %v132_v17, %v206_v19  ;;  %v135_v31 = vadd.s32 24, %v132_v17 }
  0x11   :  { %vm138_vm3 = vcmp.eq.s32.totalorder %v133_v21, %v206_v19  ;;  %vm139_vm4 = vcmp.eq.s32.totalorder %v134_v22, %v206_v19  ;;  %vm140_vm5 = vcmp.eq.s32.totalorder %v135_v31, %v206_v19  ;;  %v165_v21 = vand.u32 127, %v131_v14 }
  0x13   :  { %vm168_vm6 = vcmp.lt.s32.totalorder %v165_v21, 8 }
  0xb0   :  { %v57_v1 = vpop.trf.xlu0 }
  0xb1   :  { %v75_v6 = vsel %vm74_vm0, %v57_v1, -inf }
  0xb8   :  { %v58_v2 = vpop.trf.xlu0 }
  0xb9   :  { %v76_v4 = vsel %vm74_vm0, %v58_v2, -inf }
  0xba   :  { %v80_v9 = vmax.f32 %v75_v6, %v76_v4 }
  0xc0   :  { %v59_v3 = vpop.trf.xlu0 }
  0xc1   :  { %v77_v7 = vsel %vm74_vm0, %v59_v3, -inf }
  0xc8   :  { %v60_v5 = vpop.trf.xlu0 }
  0xc9   :  { %v79_v8 = vsel %vm78_vm1, %v60_v5, -inf }
  0xca   :  { %v81_v10 = vmax.f32 %v77_v7, %v79_v8 }
  0xcc   :  { %v82_v11 = vmax.f32 %v80_v9, %v81_v10 }
  0xce   :  { %v83_v12 = vrot.slane %v82_v11, 4 }
  0xd0   :  { %v84_v13 = vmax.f32 %v82_v11, %v83_v12 }
  0xd2   :  { %v85_v15 = vrot.slane %v84_v13, 2 }
  0xd4   :  { %v86_v16 = vmax.f32 %v84_v13, %v85_v15 }
  0xd6   :  { %v87_v18 = vrot.slane %v86_v16, 1 }
  0xd8   :  { %v88_v20 = vmax.f32 %v86_v16, %v87_v18 }
  0xda   :  { %v89_v23 = vsub.f32 %v57_v1, %v88_v20  ;;  %v90_v24 = vsub.f32 %v58_v2, %v88_v20  ;;  %v91_v25 = vsub.f32 %v59_v3, %v88_v20  ;;  %v92_v26 = vsub.f32 %v60_v5, %v88_v20 }
  0xdc   :  { %v93_v27 = vmul.f32 1.442695, %v89_v23  ;;  %v95_v28 = vmul.f32 1.442695, %v90_v24  ;;  %v97_v29 = vmul.f32 1.442695, %v91_v25 }
  0xdd   :  { %v99_v30 = vmul.f32 1.442695, %v92_v26  ;;  %v141_v32 = vsel %vm137_vm2, %v89_v23, 0.0  ;;  %v116_v33 = vsel %vm74_vm0, %v89_v23, 0.0  ;;  %v117_v34 = vsel %vm74_vm0, %v90_v24, 0.0 }
  0xde   :  { %207 = vpow2.f32 %v93_v27  ;;  %v142_v35 = vsel %vm138_vm3, %v90_v24, 0.0  ;;  %v143_v36 = vsel %vm139_vm4, %v91_v25, 0.0  ;;  %v145_v37 = vsel %vm74_vm0, %v141_v32, 0.0 }
  0xdf   :  { %209 = vpow2.f32 %v95_v28  ;;  %v146_v38 = vsel %vm74_vm0, %v142_v35, 0.0  ;;  %v118_v40 = vadd.f32 %v117_v34, %v116_v33  ;;  %v148_v41 = vsel %vm74_vm0, %v143_v36, 0.0 }
  0xe0   :  { %211 = vpow2.f32 %v97_v29  ;;  %v147_v39 = vadd.f32 %v146_v38, %v145_v37  ;;  %v144_v43 = vsel %vm140_vm5, %v92_v26, 0.0  ;;  %v119_v47 = vsel %vm74_vm0, %v91_v25, 0.0 }
  0xe1   :  { %213 = vpow2.f32 %v99_v30  ;;  %v120_v50 = vadd.f32 %v119_v47, %v118_v40  ;;  %v150_v53 = vsel %vm78_vm1, %v144_v43, 0.0  ;;  %v121_v57 = vsel %vm78_vm1, %v92_v26, 0.0 }
  0xe2   :  { %v149_v44 = vadd.f32 %v148_v41, %v147_v39 }
  0xe3   :  { %v122_v59 = vadd.f32 %v121_v57, %v120_v50 }
  0xe4   :  { %v208_v42 = vpop.eup %207  ;;  %v151_v55 = vadd.f32 %v150_v53, %v149_v44 }
  0xe5   :  { %v210_v45 = vpop.eup %209  ;;  %v101_v46 = vsel %vm74_vm0, %v208_v42, 0.0  ;;  %v123_v63 = vrot.slane %v122_v59, 4 }
  0xe6   :  { %v212_v48 = vpop.eup %211  ;;  %v102_v49 = vsel %vm74_vm0, %v210_v45, 0.0  ;;  %v152_v61 = vrot.slane %v151_v55, 4 }
  0xe7   :  { %v214_v51 = vpop.eup %213  ;;  %v103_v52 = vadd.f32 %v102_v49, %v101_v46  ;;  %v104_v54 = vsel %vm74_vm0, %v212_v48, 0.0  ;;  %v124_v3 = vadd.f32 %v123_v63, %v122_v59 }
  0xe8   :  { %v106_v58 = vsel %vm78_vm1, %v214_v51, 0.0  ;;  %v153_v1 = vadd.f32 %v152_v61, %v151_v55 }
  0xe9   :  { %v105_v56 = vadd.f32 %v104_v54, %v103_v52  ;;  %v125_v7 = vrot.slane %v124_v3, 2 }
  0xea   :  { %v154_v5 = vrot.slane %v153_v1, 2 }
  0xeb   :  { %v107_v60 = vadd.f32 %v106_v58, %v105_v56  ;;  %v126_v10 = vadd.f32 %v125_v7, %v124_v3 }
  0xec   :  { %v155_v9 = vadd.f32 %v154_v5, %v153_v1 }
  0xed   :  { %v108_v62 = vrot.slane %v107_v60, 4  ;;  %v127_v12 = vrot.slane %v126_v10, 1 }
  0xee   :  { %v156_v11 = vrot.slane %v155_v9, 1 }
  0xef   :  { %v109_v0 = vadd.f32 %v108_v62, %v107_v60  ;;  %v128_v17 = vadd.f32 %v127_v12, %v126_v10 }
  0xf0   :  { %v157_v16 = vadd.f32 %v156_v11, %v155_v9 }
  0xf1   :  { %v110_v2 = vrot.slane %v109_v0, 2 }
  0xf3   :  { %v111_v4 = vadd.f32 %v110_v2, %v109_v0 }
  0xf5   :  { %v112_v6 = vrot.slane %v111_v4, 1 }
  0xf7   :  { %v113_v8 = vadd.f32 %v112_v6, %v111_v4 }
  0xf9   :  { %215 = vlog2.f32 %v113_v8 }
  0xff   :  { %v216_v13 = vpop.eup %215 }
 0x100   :  { %v115_v15 = vmul.f32 0.6931472, %v216_v13 }
 0x102   :  { %v129_v18 = vmul.f32 30.0, %v115_v15  ;;  %v158_v19 = vsub.f32 %v157_v16, %v115_v15 }
 0x104   :  { %v130_v20 = vsub.f32 %v128_v17, %v129_v18  ;;  %v160_v23 = vmul.f32 0.79310346, %v158_v19 }
 0x106   :  { %v159_v22 = vmul.f32 0.0068965517, %v130_v20 }
 0x108   :  { %v161_v24 = vadd.f32 %v160_v23, %v159_v22 }
 0x10a   :  { %v162_v25 = vsub.f32 0.0, %v161_v24 }
 0x10c   :  { %v169_v26 = vsel %vm168_vm6, %v162_v25, 0.0 }
 0x10d   :  { %v171_v27 = vsel %vm170_vm7, %v169_v26, 0.0 }
 0x10e   :  { %172 = vadd.xlane.f32.xlu0 %v171_v27 }
 0x181   :  { %v173_v28 = vpop.xlane.xlu0 %172 }
 0x182   :  { %v174_v29 = vrot.slane %v173_v28, 4 }
 0x184   :  { %v175_v30 = vadd.f32 %v174_v29, %v173_v28 }
 0x186   :  { %v176_v31 = vrot.slane %v175_v30, 2 }
 0x188   :  { %v177_v32 = vadd.f32 %v176_v31, %v175_v30 }
 0x18a   :  { %v178_v33 = vrot.slane %v177_v32, 1 }
 0x18c   :  { %v179_v34 = vadd.f32 %v178_v33, %v177_v32 }
 0x18e   :  { %200 = vpush %v179_v34 }
 0x1bf   :  { %s201_s20 = spop %200 }
 0x1c0   :  { %182 = sst [smem:[#allocation7]] %s201_s20 }
 0x1c1   :  { %191 = dma.smem_to_hbm %s285_s21, 16, %s189_s19, [#allocation4]  }
 0x1c2   :  { %281 = dma.done.wait [#allocation4], 16  }
 0x1c3   :  { %282 = vsyncadd [#allocation4], 4294967280 }
 0x1c4   :  { %196 = sfence }
 0x1c5   :  { %197 = vsyncpa [#allocation3], 1 }
 0x1c6   :  { %198 = vsyncpa [#allocation6], 1 }
 0x1c7   :  { %199 = vsyncpa [#allocation4], 1 }

</bundles_post_ra>
